<compile_context>
chip_gen: v7x
topology: tpu7x:2x2x1
jax: 0.10.0
libtpu: 0.0.40
codegen_flags: <defaults>
</compile_context>

<pallas_src>
import jax
import jax.numpy as jnp
from jax.experimental import pallas as pl
from jax.experimental.pallas import tpu as pltpu


def _policy_kernel(x_ref, w_ref, b_ref, o_ref):
    # out = x @ W_fused + b_fused   (single MXU matmul, f32 accumulation)
    y = jnp.dot(x_ref[...], w_ref[...], preferred_element_type=jnp.float32)
    o_ref[...] = (y + b_ref[...]).astype(o_ref.dtype)


def fuse_policy_params(w1, b1, w2, b2):
    """Fold fc1/fc2 into one affine map. Call ONCE per parameter update
    (e.g. after init or add_policy), not per forward call.

    Weights are stored transposed relative to PyTorch: w1 [in, hidden],
    w2 [hidden, out].  Returns (w_fused [in, out], b_fused [1, out] f32)."""
    w1f = w1.astype(jnp.float32)
    w2f = w2.astype(jnp.float32)
    w_fused = jnp.dot(w1f, w2f, preferred_element_type=jnp.float32).astype(w1.dtype)
    b_fused = (jnp.dot(b1.astype(jnp.float32), w2f) + b2.astype(jnp.float32))
    return w_fused, b_fused.reshape(1, -1).astype(jnp.float32)


def parametric_policy_forward_fused(x, w_fused, b_fused_2d, *, compute_dtype=None):
    """x: [B, in]; w_fused: [in, out]; b_fused_2d: [1, out] (f32).

    Computes x @ w_fused + b_fused == fc2(fc1(x)) of the PyTorch module."""
    B, in_sz = x.shape
    in_w, out_sz = w_fused.shape
    assert in_w == in_sz and b_fused_2d.shape == (1, out_sz)

    if compute_dtype is not None:
        x = x.astype(compute_dtype)
        w_fused = w_fused.astype(compute_dtype)

    itemsize = jnp.dtype(x.dtype).itemsize
    w_itemsize = jnp.dtype(w_fused.dtype).itemsize

    # --- Adaptive batch tile: ~2 MiB of x per grid step, multiple of 8. ---
    tb_target = (2 << 20) // max(1, in_sz * itemsize)
    tb_target = max(8, min(8192, (tb_target // 8) * 8))

    if B <= tb_target:
        if B >= 16:
            # Keep >= 2 grid steps so the "parallel" batch axis can be split
            # across the 2 TensorCores on v7x (near-zero cost on v5e/v6e).
            tb = max(8, ((pl.cdiv(B, 2) + 7) // 8) * 8)
        else:
            tb = B  # block dim equals full array dim -> always legal
    else:
        tb = tb_target
    grid_b = pl.cdiv(B, tb)  # trailing partial block is masked by Pallas

    # --- Fused-weight residency / buffering. ---
    w_bytes = in_sz * out_sz * w_itemsize
    single_buffer_w = w_bytes > (8 << 20)  # constant index_map: 1 buffer is enough
    if single_buffer_w:
        w_spec = pl.BlockSpec((in_sz, out_sz), lambda i: (0, 0),
                              pipeline_mode=pl.Buffered(1))
    else:
        w_spec = pl.BlockSpec((in_sz, out_sz), lambda i: (0, 0))
    w_bufs = 1 if single_buffer_w else 2

    # --- Explicit VMEM budget (v5e default scoped limit is only 16 MiB). ---
    vmem_need = (2 * tb * in_sz * itemsize        # x, double-buffered
                 + 2 * tb * out_sz * itemsize     # out, double-buffered
                 + w_bufs * w_bytes               # resident fused weight
                 + 2 * out_sz * 4)                # fused bias (f32)
    vmem_limit = int(min(max(2 * vmem_need, 8 << 20), 100 << 20))

    cost = pl.CostEstimate(
        flops=2 * B * in_sz * out_sz,
        transcendentals=0,
        bytes_accessed=(B * in_sz * itemsize
                        + w_bytes
                        + out_sz * 4
                        + B * out_sz * itemsize),
    )

    return pl.pallas_call(
        _policy_kernel,
        out_shape=jax.ShapeDtypeStruct((B, out_sz), x.dtype),
        grid_spec=pltpu.PrefetchScalarGridSpec(
            num_scalar_prefetch=0,
            grid=(grid_b,),
            in_specs=[
                # x: tiled over batch rows (last dim = full in_sz).
                pl.BlockSpec((tb, in_sz), lambda i: (i, 0)),
                # Fused weight: constant index_map -> stays VMEM-resident.
                w_spec,
                # Fused bias (full array as one block).
                pl.BlockSpec((1, out_sz), lambda i: (0, 0)),
            ],
            out_specs=pl.BlockSpec((tb, out_sz), lambda i: (i, 0)),
        ),
        compiler_params=pltpu.CompilerParams(
            dimension_semantics=("parallel",),
            vmem_limit_bytes=vmem_limit,
        ),
        cost_estimate=cost,
    )(x, w_fused, b_fused_2d)


def parametric_policy_forward(x, w1, b1, w2, b2, **kwargs):
    """Convenience one-off wrapper (prefer fuse_policy_params + *_fused)."""
    w_fused, b_fused = fuse_policy_params(w1, b1, w2, b2)
    return parametric_policy_forward_fused(x, w_fused, b_fused, **kwargs)


def init_params(key, input_size, hidden_size, output_size):
    """Deterministic init mimicking torch.nn.Linear (uniform +/- 1/sqrt(fan_in)).
    Weights are stored transposed relative to PyTorch: [in, out]."""
    k1, k2, k3, k4 = jax.random.split(key, 4)
    bound1 = 1.0 / jnp.sqrt(input_size)
    bound2 = 1.0 / jnp.sqrt(hidden_size)
    w1 = jax.random.uniform(k1, (input_size, hidden_size), jnp.float32, -bound1, bound1)
    b1 = jax.random.uniform(k2, (hidden_size,), jnp.float32, -bound1, bound1)
    w2 = jax.random.uniform(k3, (hidden_size, output_size), jnp.float32, -bound2, bound2)
    b2 = jax.random.uniform(k4, (output_size,), jnp.float32, -bound2, bound2)
    return w1, b1, w2, b2


if __name__ == "__main__":
    input_size, hidden_size, output_size = 32, 64, 16
    batch = 8

    key = jax.random.PRNGKey(0)
    kx, kp = jax.random.split(key)
    x = jax.random.normal(kx, (batch, input_size), jnp.float32)
    w1, b1, w2, b2 = init_params(kp, input_size, hidden_size, output_size)

    # Fusion hoisted out of the forward path: do it once per param update.
    w_fused, b_fused = fuse_policy_params(w1, b1, w2, b2)

    out = parametric_policy_forward_fused(x, w_fused, b_fused)
    out = jax.block_until_ready(out)

    # Reference: unfused two-layer math, identical to PyTorch fc2(fc1(x)).
    ref = (x @ w1 + b1) @ w2 + b2
    assert out.shape == (batch, output_size)
    assert jnp.allclose(out, ref, atol=1e-4, rtol=1e-4)

    print("KERNEL_OK")
</pallas_src>

<mosaic_0001>
module attributes {stable_mosaic.version = 11 : i64} {
  func.func @_policy_kernel(%arg0: i32, %arg1: memref<8x32xf32, #tpu.memory_space<vmem>>, %arg2: memref<32x16xf32, #tpu.memory_space<vmem>>, %arg3: memref<1x16xf32, #tpu.memory_space<vmem>>, %arg4: memref<8x16xf32, #tpu.memory_space<vmem>>) attributes {dimension_semantics = [#tpu.dimension_semantics<parallel>], iteration_bounds = array<i64: 1>, scalar_prefetch = 0 : i64, scratch_operands = 0 : i64, tpu.core_type = #tpu.core_type<tc>, window_params = [{transform_indices = @transform_0, window_bounds = array<i64: 8, 32>}, {pipeline_mode = #tpu.pipeline_mode<synchronous>, transform_indices = @transform_1, window_bounds = array<i64: 32, 16>}, {pipeline_mode = #tpu.pipeline_mode<synchronous>, transform_indices = @transform_2, window_bounds = array<i64: 1, 16>}, {transform_indices = @transform_3, window_bounds = array<i64: 8, 16>}]} {
    %c0 = arith.constant 0 : index
    %c0_0 = arith.constant 0 : index
    %0 = vector.load %arg1[%c0, %c0_0] : memref<8x32xf32, #tpu.memory_space<vmem>>, vector<8x32xf32>
    %c0_1 = arith.constant 0 : index
    %c0_2 = arith.constant 0 : index
    %1 = vector.load %arg2[%c0_1, %c0_2] : memref<32x16xf32, #tpu.memory_space<vmem>>, vector<32x16xf32>
    %cst = arith.constant dense<0.000000e+00> : vector<8x16xf32>
    %2 = tpu.matmul %0, %1, %cst {dimension_numbers = #tpu.dot_dimension_numbers<[1], [0], [0], [1], [0, 0, 1, 1], [], []>} : vector<8x32xf32>, vector<32x16xf32>, vector<8x16xf32> -> vector<8x16xf32>
    %c0_3 = arith.constant 0 : index
    %c0_4 = arith.constant 0 : index
    %3 = vector.load %arg3[%c0_3, %c0_4] : memref<1x16xf32, #tpu.memory_space<vmem>>, vector<1x16xf32>
    %4 = vector.broadcast %3 : vector<1x16xf32> to vector<8x16xf32>
    %5 = arith.addf %2, %4 : vector<8x16xf32>
    %c0_5 = arith.constant 0 : index
    %c0_6 = arith.constant 0 : index
    %6 = vector.load %arg4[%c0_5, %c0_6] : memref<8x16xf32, #tpu.memory_space<vmem>>, vector<8x16xf32>
    tpu.vector_store %arg4[%c0_5, %c0_6], %5 {strides = array<i32>} : memref<8x16xf32, #tpu.memory_space<vmem>>, vector<8x16xf32>,
    return
  }
  func.func @transform_0(%arg0: i32) -> (i32, i32) {
    %c0_i32 = arith.constant 0 : i32
    %c0_i32_0 = arith.constant 0 : i32
    return %arg0, %c0_i32 : i32, i32
  }
  func.func @transform_1(%arg0: i32) -> (i32, i32) {
    %c0_i32 = arith.constant 0 : i32
    %c0_i32_0 = arith.constant 0 : i32
    %c0_i32_1 = arith.constant 0 : i32
    return %c0_i32, %c0_i32_0 : i32, i32
  }
  func.func @transform_2(%arg0: i32) -> (i32, i32) {
    %c0_i32 = arith.constant 0 : i32
    %c0_i32_0 = arith.constant 0 : i32
    %c0_i32_1 = arith.constant 0 : i32
    return %c0_i32, %c0_i32_0 : i32, i32
  }
  func.func @transform_3(%arg0: i32) -> (i32, i32) {
    %c0_i32 = arith.constant 0 : i32
    %c0_i32_0 = arith.constant 0 : i32
    return %arg0, %c0_i32 : i32, i32
  }
}

</mosaic_0001>

<bundles_post_ra>
// kernel: tpu_custom_call.1
= control target key start
LH: loop header
LB: loop body
LE: loop exit
PB: predicated region body
PF: predicated region fallthrough
CT: control target
= control target key end

     0   :  { %v169_v3 = vmov 0.0|0.0   ;;  %vm170_vm0 = vmmov 0   ;;  %v171_v6 = vmov 0.0   ;;  %s223_s0 = inlined_call_operand.vmem [shape: f32[8,32], index: 0, kind: input, shape index: {}]   ;;  %s224_s1 = inlined_call_operand.vmem [shape: f32[32,16], index: 1, kind: input, shape index: {}]   ;;  %s225_s2 = inlined_call_operand.vmem [shape: f32[1,16], index: 2, kind: input, shape index: {}]   ;;  %s226_s3 = inlined_call_operand.hbm [shape: f32[8,16], index: 3, kind: output, shape index: {}]  }
   0x1   :  { %v16_v0 = vld [vmem:[%s224_s1] sm:$0xff]  ;;  %v17_v1 = vld [vmem:[%s224_s1 + $0x8] sm:$0xff]  ;;  %v18_v2 = vld [vmem:[%s224_s1 + $0x10] sm:$0xff]  ;;  %135 = vmatprep.subr.bf16.mxu0 %v169_v3  ;;  %132 = vmatprep.mubr.msk.f32.mxu0 %vm170_vm0, %v171_v6 }
   0x2   :  { %v136_v4 = vpack.c.bf16 %v17_v1, %v16_v0  ;;  %v19_v5 = vld [vmem:[%s224_s1 + $0x18] sm:$0xff] }
   0x3   :  { %8 = vsyncpa [#allocation3], 0  ;;  %v139_v7 = vpack.c.bf16 %v19_v5, %v18_v2  ;;  %v15_v8 = vld [vmem:[%s223_s0] sm:$0xff]  ;;  %vm27_vm1 = vcmask 261120   ;;  %s172_s24 = smov [#allocation2]   ;;  %vm101_vm2 = vcmask 130048  }
   0x4   :  { %137 = vmatpush3.bf16.msra.mxu0 %v136_v4  ;;  %v117_v9 = vld [vmem:[%s225_s2] ss:$0 sm:$0xff]  ;;  %s109_s1 = sshll.u32 %s172_s24, 4  ;;  %s110_s1 = int_to_ptr.vmem [resolvable:$true] %s109_s1 }
   0x5   :  { %138 = vmatprep.subr.bf16.mxu0 %v169_v3  ;;  %s145_s25 = scalar_lea.vmem %s110_s1, 128  ;;  %p150_p1 = scmp.lt.s32.totalorder %s110_s1, %s110_s1 }
   0x6   :  { %p146_p0 = scmp.ne.s32.totalorder %s110_s1, %s145_s25  ;;  %p151_p2 = scmp.lt.s32.totalorder %s145_s25, %s145_s25 }
   0x8   :  { %140 = vmatpush3.bf16.msra.mxu0 %v139_v7  ;;  %p152_p3 = por %p151_p2, %p150_p1 }
   0xa   :  { %p153_p4 = pnand %p152_p3, %p146_p0 }
   0xb   :  { %133 = vmatmul.mubr.msk.f32.vlgmr.msra.gmra.mrb[0].mxu0 %vm27_vm1, %v15_v8 }
  0xde   :  { %v97_v10 = vpop.f32.mrb[0].mxu0 }
  0xdf   :  { %v98_v11 = vadd.f32 %v117_v9, %v97_v10  ;;  %v134_v12 = vpop.f32.mrb[1].mxu0 }
  0xe1   :  { %102 = vst.msk [vmem:[#allocation2] sm:$0xff] %vm101_vm2, %v98_v11 }
  0xe2   :  { %156 = shalt.err (!%p153_p4)
}
  0xe3   :  { %s157_s27 = scalar_lea.hbm %s226_s3, 128 }
  0xe4   :  { %p158_p5 = scmp.ne.s32.totalorder %s226_s3, %s157_s27  ;;  %p161_p6 = scmp.lt.u32.totalorder %s157_s27, %s226_s3 }
  0xe6   :  { %p163_p7 = pnand %p161_p6, %p158_p5 }
  0xe8   :  { %166 = shalt.err (!%p163_p7)
}
  0xe9   :  { %112 = dma.vmem_to_hbm [thread:$0]  %s110_s1, 128, %s226_s3, [#allocation3]  }
  0xea   :  { %167 = dma.done.wait [#allocation3], 128  }
  0xeb   :  { %168 = vsyncadd [#allocation3], 4294967168 }
  0xec   :  { %116 = vsyncpa [#allocation3], 1 }

</bundles_post_ra>
